<compile_context>
chip_gen: v7x
topology: tpu7x:2x2x1
jax: 0.10.0
libtpu: 0.0.40
codegen_flags: <defaults>
</compile_context>

<pallas_src>
import math
import functools

import jax
import jax.numpy as jnp
from jax.experimental import pallas as pl
from jax.experimental.pallas import tpu as pltpu


_MXU_DTYPE = jnp.bfloat16          # MXU operand dtype (f32 accumulation)
_VMEM_LIMIT = 48 * 1024 * 1024     # explicit scoped-VMEM limit (portable v5e..v7x)
_VMEM_BUDGET = 40 * 1024 * 1024    # target double-buffered working set


def _pick_tile(dim, target, align):
    """Largest t <= target with t % align == 0 and dim % t == 0.

    Falls back to the full dimension (which always satisfies the Mosaic
    "block == full dim" escape hatch) only when no aligned divisor exists.
    """
    t = min(dim, target)
    t -= t % align
    while t >= align:
        if dim % t == 0:
            return t
        t -= align
    return dim


# --------------------------------------------------------------------------
# Kernel 1: tiled matmul  y = x @ wt   (wt is the pre-transposed weight)
# --------------------------------------------------------------------------
def _matmul_kernel(x_ref, wt_ref, o_ref, acc_ref):
    @pl.when(pl.program_id(2) == 0)
    def _init():
        acc_ref[...] = jnp.zeros_like(acc_ref)

    acc_ref[...] += jnp.dot(
        x_ref[...].astype(_MXU_DTYPE),
        wt_ref[...].astype(_MXU_DTYPE),
        preferred_element_type=jnp.float32,
    )

    @pl.when(pl.program_id(2) == pl.num_programs(2) - 1)
    def _finalize():
        o_ref[...] = acc_ref[...].astype(o_ref.dtype)


def matmul(x, wt, *, out_dtype=None, tm=512, tn=1024, tk=2048):
    """x: [M, K], wt: [K, N] (already transposed weight) -> [M, N]."""
    M, K = x.shape
    K2, N = wt.shape
    assert K == K2, "contracting dims must match"
    out_dtype = out_dtype if out_dtype is not None else x.dtype
    itemsize = jnp.dtype(x.dtype).itemsize

    tm = _pick_tile(M, tm, 8)
    tn = _pick_tile(N, tn, 128)
    tk = _pick_tile(K, tk, 128)

    # Cap the double-buffered working set (2 bufs per operand + f32 acc) so the
    # same tile choice is safe on v7x's 64 MiB VMEM as well as v5e/v6e.
    def _ws(tm_, tn_, tk_):
        return 2 * (tm_ * tk_ + tk_ * tn_ + tm_ * tn_) * itemsize + tm_ * tn_ * 4

    while _ws(tm, tn, tk) > _VMEM_BUDGET:
        if tk > 128 and K % 128 == 0:
            tk = _pick_tile(K, max(tk // 2, 128), 128)
        elif tn > 128 and N % 128 == 0:
            tn = _pick_tile(N, max(tn // 2, 128), 128)
        elif tm > 8 and M % 8 == 0:
            tm = _pick_tile(M, max(tm // 2, 8), 8)
        else:
            break

    return pl.pallas_call(
        _matmul_kernel,
        out_shape=jax.ShapeDtypeStruct((M, N), out_dtype),
        grid_spec=pltpu.PrefetchScalarGridSpec(
            num_scalar_prefetch=0,
            grid=(M // tm, N // tn, K // tk),
            in_specs=[
                pl.BlockSpec((tm, tk), lambda i, j, k: (i, k)),
                pl.BlockSpec((tk, tn), lambda i, j, k: (k, j)),
            ],
            out_specs=pl.BlockSpec((tm, tn), lambda i, j, k: (i, j)),
            scratch_shapes=[pltpu.VMEM((tm, tn), jnp.float32)],
        ),
        compiler_params=pltpu.CompilerParams(
            dimension_semantics=("parallel", "parallel", "arbitrary"),
            vmem_limit_bytes=_VMEM_LIMIT,
        ),
        cost_estimate=pl.CostEstimate(
            flops=2 * M * N * K,
            transcendentals=0,
            bytes_accessed=(M * K + K * N + M * N) * itemsize,
        ),
    )(x, wt)


# --------------------------------------------------------------------------
# Kernel 2: scaled-dot-product attention.
# Grid = (batch, q-tiles, head-groups); each step handles one lane-dense group
# of heads for one q-row tile, using an additive mask bias.
# --------------------------------------------------------------------------
def _mha_kernel(q_ref, k_ref, v_ref, m_ref, o_ref, *, heads_per_group, d_k):
    # q block [1, tq, Wg], k/v blocks [1, S, Wg], bias block [1, tq, S].
    scale = 1.0 / math.sqrt(d_k)
    bias = m_ref[0].astype(jnp.float32)                  # [tq, S], loaded once

    outs = []
    for h in range(heads_per_group):                     # small, bounded unroll
        lo = h * d_k
        # fold 1/sqrt(d_k) into q (tq*d_k multiplies instead of tq*S)
        qh = (q_ref[0, :, lo:lo + d_k].astype(jnp.float32) * scale).astype(_MXU_DTYPE)
        kh = k_ref[0, :, lo:lo + d_k].astype(_MXU_DTYPE)
        vh = v_ref[0, :, lo:lo + d_k].astype(_MXU_DTYPE)

        # q @ k^T: contract the last dims (no materialized transpose).
        s = jax.lax.dot_general(
            qh, kh, (((1,), (1,)), ((), ())),
            preferred_element_type=jnp.float32,
        )                                                # [tq, S] f32
        s = s + bias                                     # masked_fill_ semantics

        # numerically stable softmax (statistics kept in f32)
        s_max = jnp.max(s, axis=-1, keepdims=True)
        e = jnp.exp(s - s_max)
        denom = jnp.sum(e, axis=-1, keepdims=True)
        p = e * pl.reciprocal(denom, approx=True)        # EUP vrcp: ~free slot

        outs.append(
            jnp.dot(p.astype(_MXU_DTYPE), vh, preferred_element_type=jnp.float32)
        )                                                # [tq, d_k] f32

    # single lane-dense store of the whole group (width = heads_per_group*d_k)
    o_ref[0] = jnp.concatenate(outs, axis=-1).astype(o_ref.dtype)


def _attention(query, key, value, bias, *, num_heads, d_k):
    B, S, D = query.shape

    # Group heads so each step's lane width is a multiple of 128 (or == D).
    hpg = num_heads
    for cand in range(1, num_heads + 1):
        if num_heads % cand == 0 and (cand * d_k) % 128 == 0:
            hpg = cand
            break
    group_w = hpg * d_k
    n_groups = num_heads // hpg

    tq = _pick_tile(S, 256, 8)
    n_qt = S // tq

    kernel = functools.partial(_mha_kernel, heads_per_group=hpg, d_k=d_k)
    itemsize = jnp.dtype(query.dtype).itemsize

    return pl.pallas_call(
        kernel,
        out_shape=jax.ShapeDtypeStruct((B, S, D), query.dtype),
        grid_spec=pltpu.PrefetchScalarGridSpec(
            num_scalar_prefetch=0,
            grid=(B, n_qt, n_groups),          # head-groups innermost: the bias
            in_specs=[                          # block index is constant across
                pl.BlockSpec((1, tq, group_w), lambda b, qi, g: (b, qi, g)),
                pl.BlockSpec((1, S, group_w), lambda b, qi, g: (b, 0, g)),
                pl.BlockSpec((1, S, group_w), lambda b, qi, g: (b, 0, g)),
                pl.BlockSpec((1, tq, S), lambda b, qi, g: (b, qi, 0)),
            ],
            out_specs=pl.BlockSpec((1, tq, group_w), lambda b, qi, g: (b, qi, g)),
        ),
        compiler_params=pltpu.CompilerParams(
            dimension_semantics=("parallel", "parallel", "parallel"),
            vmem_limit_bytes=_VMEM_LIMIT,
        ),
        cost_estimate=pl.CostEstimate(
            flops=4 * B * S * S * D,                    # QK^T + PV over all heads
            transcendentals=B * num_heads * S * S,      # exp
            bytes_accessed=(4 * B * S * D + B * S * S) * itemsize,
        ),
    )(query, key, value, bias)


# --------------------------------------------------------------------------
# Module forward: W_q/W_k/W_v projections -> per-head attention -> W_o.
# --------------------------------------------------------------------------
def multi_head_attention(q, k, v, encoder_mask, prepared, num_heads):
    """
    q, k, v: [B, S, D]
    encoder_mask: [B, 1, S, S] (or [B, S, S]); 0 => masked out.
    prepared: dict with pre-transposed, pre-cast (bf16) weights
              'Wq_T','Wk_T','Wv_T','Wo_T', each [D_in, D_out] (== PyTorch W.T).
    """
    B, S, D = q.shape
    assert D % num_heads == 0, "d_model must be divisible by number of heads"
    d_k = D // num_heads
    out_dtype = q.dtype

    # --- cast activations to bf16 once (MXU fast path, half the HBM traffic) ---
    q_ = q.astype(_MXU_DTYPE).reshape(B * S, D)
    k_ = k.astype(_MXU_DTYPE).reshape(B * S, D)
    v_ = v.astype(_MXU_DTYPE).reshape(B * S, D)

    # --- projections (tiled Pallas matmuls, weights pre-transposed/pre-cast) ---
    query = matmul(q_, prepared["Wq_T"]).reshape(B, S, D)   # bf16 out
    key = matmul(k_, prepared["Wk_T"]).reshape(B, S, D)
    value = matmul(v_, prepared["Wv_T"]).reshape(B, S, D)

    # --- mask -> additive bias, shared across heads, shipped as bf16 ---
    mask = encoder_mask
    if mask.ndim == 4:
        mask = mask.reshape(B, mask.shape[-2], mask.shape[-1])
    mask = jnp.broadcast_to(mask, (B, S, S))
    bias = jnp.where(mask == 0, jnp.float32(-1e9), jnp.float32(0.0)).astype(_MXU_DTYPE)

    # --- attention (lane-dense head-group blocks, merged output layout) ---
    attn = _attention(query, key, value, bias, num_heads=num_heads, d_k=d_k)

    # --- output projection (back to the caller's dtype) ---
    out = matmul(attn.reshape(B * S, D), prepared["Wo_T"], out_dtype=out_dtype)
    return out.reshape(B, S, D)


# --------------------------------------------------------------------------
# Parameter init (PyTorch nn.Linear layout: [out, in], no bias) + one-time
# preparation (store W^T in bf16 so no per-call transpose/cast is emitted).
# --------------------------------------------------------------------------
def init_params(key, d_model):
    keys = jax.random.split(key, 4)
    bound = 1.0 / math.sqrt(d_model)
    names = ["W_q", "W_k", "W_v", "W_o"]
    return {
        n: jax.random.uniform(
            kk, (d_model, d_model), jnp.float32, minval=-bound, maxval=bound
        )
        for n, kk in zip(names, keys)
    }


def prepare_params(params):
    return {
        "Wq_T": params["W_q"].T.astype(_MXU_DTYPE),
        "Wk_T": params["W_k"].T.astype(_MXU_DTYPE),
        "Wv_T": params["W_v"].T.astype(_MXU_DTYPE),
        "Wo_T": params["W_o"].T.astype(_MXU_DTYPE),
    }


if __name__ == "__main__":
    B, S, D, H = 2, 8, 32, 4

    root = jax.random.PRNGKey(0)
    kp, kq, kk_, kv = jax.random.split(root, 4)

    params = init_params(kp, D)
    prepared = prepare_params(params)

    q = jax.random.normal(kq, (B, S, D), jnp.float32)
    k = jax.random.normal(kk_, (B, S, D), jnp.float32)
    v = jax.random.normal(kv, (B, S, D), jnp.float32)

    # encoder mask with some zeroed key positions (mask == 0 => masked out)
    col = jnp.arange(S)
    valid_len = jnp.array([S, S - 3])                       # batch 1: pad last 3 keys
    key_mask = (col[None, :] < valid_len[:, None]).astype(jnp.int32)  # [B, S_k]
    encoder_mask = jnp.broadcast_to(key_mask[:, None, None, :], (B, 1, S, S))

    out = multi_head_attention(q, k, v, encoder_mask, prepared, num_heads=H)
    jax.block_until_ready(out)

    # reference in plain JAX f32 (same math as the PyTorch module)
    def ref(q, k, v, m, p):
        d_kk = D // H

        def pr(x, w):
            return (x.reshape(B * S, D) @ w.T).reshape(B, S, H, d_kk).transpose(0, 2, 1, 3)

        Q, K, V = pr(q, p["W_q"]), pr(k, p["W_k"]), pr(v, p["W_v"])
        s = jnp.einsum("bhqd,bhkd->bhqk", Q, K) / math.sqrt(d_kk)
        s = jnp.where(m == 0, -1e9, s)
        a = jax.nn.softmax(s, axis=-1)
        o = jnp.einsum("bhqk,bhkd->bhqd", a, V)
        o = o.transpose(0, 2, 1, 3).reshape(B, S, D)
        return (o.reshape(B * S, D) @ p["W_o"].T).reshape(B, S, D)

    expected = ref(q, k, v, encoder_mask, params)
    # tolerance accommodates bf16 MXU operands + the approximate EUP reciprocal
    assert jnp.allclose(out, expected, atol=5e-2, rtol=5e-2), "mismatch vs reference"

    print("KERNEL_OK")
</pallas_src>

<mosaic_0001>
module attributes {stable_mosaic.version = 11 : i64} {
  func.func @_matmul_kernel(%arg0: i32, %arg1: i32, %arg2: i32, %arg3: memref<16x32xbf16, #tpu.memory_space<vmem>>, %arg4: memref<32x32xbf16, #tpu.memory_space<vmem>>, %arg5: memref<16x32xbf16, #tpu.memory_space<vmem>>, %arg6: memref<16x32xf32, #tpu.memory_space<vmem>>) attributes {dimension_semantics = [#tpu.dimension_semantics<parallel>, #tpu.dimension_semantics<parallel>, #tpu.dimension_semantics<arbitrary>], iteration_bounds = array<i64: 1, 1, 1>, scalar_prefetch = 0 : i64, scratch_operands = 1 : i64, tpu.core_type = #tpu.core_type<tc>, window_params = [{transform_indices = @transform_0, window_bounds = array<i64: 16, 32>}, {transform_indices = @transform_1, window_bounds = array<i64: 32, 32>}, {transform_indices = @transform_2, window_bounds = array<i64: 16, 32>}]} {
    %c0_i32 = arith.constant 0 : i32
    %0 = arith.cmpi eq, %arg2, %c0_i32 : i32
    %1 = arith.extui %0 : i1 to i32
    %c0_i32_0 = arith.constant 0 : i32
    %2 = arith.cmpi ne, %1, %c0_i32_0 : i32
    scf.if %2 {
      %cst_10 = arith.constant 0.000000e+00 : f32
      %12 = vector.broadcast %cst_10 : f32 to vector<16x32xf32>
      %c0_11 = arith.constant 0 : index
      %c0_12 = arith.constant 0 : index
      %13 = vector.load %arg6[%c0_11, %c0_12] : memref<16x32xf32, #tpu.memory_space<vmem>>, vector<16x32xf32>
      tpu.vector_store %arg6[%c0_11, %c0_12], %12 {strides = array<i32>} : memref<16x32xf32, #tpu.memory_space<vmem>>, vector<16x32xf32>,
    } else {
    }
    %c0 = arith.constant 0 : index
    %c0_1 = arith.constant 0 : index
    %3 = vector.load %arg6[%c0, %c0_1] : memref<16x32xf32, #tpu.memory_space<vmem>>, vector<16x32xf32>
    %c0_2 = arith.constant 0 : index
    %c0_3 = arith.constant 0 : index
    %4 = vector.load %arg3[%c0_2, %c0_3] : memref<16x32xbf16, #tpu.memory_space<vmem>>, vector<16x32xbf16>
    %c0_4 = arith.constant 0 : index
    %c0_5 = arith.constant 0 : index
    %5 = vector.load %arg4[%c0_4, %c0_5] : memref<32x32xbf16, #tpu.memory_space<vmem>>, vector<32x32xbf16>
    %cst = arith.constant dense<0.000000e+00> : vector<16x32xf32>
    %6 = tpu.matmul %4, %5, %cst {dimension_numbers = #tpu.dot_dimension_numbers<[1], [0], [0], [1], [0, 0, 1, 1], [], []>} : vector<16x32xbf16>, vector<32x32xbf16>, vector<16x32xf32> -> vector<16x32xf32>
    %7 = arith.addf %3, %6 : vector<16x32xf32>
    %c0_6 = arith.constant 0 : index
    %c0_7 = arith.constant 0 : index
    %8 = vector.load %arg6[%c0_6, %c0_7] : memref<16x32xf32, #tpu.memory_space<vmem>>, vector<16x32xf32>
    tpu.vector_store %arg6[%c0_6, %c0_7], %7 {strides = array<i32>} : memref<16x32xf32, #tpu.memory_space<vmem>>, vector<16x32xf32>,
    %c0_i32_8 = arith.constant 0 : i32
    %9 = arith.cmpi eq, %arg2, %c0_i32_8 : i32
    %10 = arith.extui %9 : i1 to i32
    %c0_i32_9 = arith.constant 0 : i32
    %11 = arith.cmpi ne, %10, %c0_i32_9 : i32
    scf.if %11 {
      %c0_10 = arith.constant 0 : index
      %c0_11 = arith.constant 0 : index
      %12 = vector.load %arg6[%c0_10, %c0_11] : memref<16x32xf32, #tpu.memory_space<vmem>>, vector<16x32xf32>
      %13 = arith.truncf %12 : vector<16x32xf32> to vector<16x32xbf16>
      %c0_12 = arith.constant 0 : index
      %c0_13 = arith.constant 0 : index
      %14 = vector.load %arg5[%c0_12, %c0_13] : memref<16x32xbf16, #tpu.memory_space<vmem>>, vector<16x32xbf16>
      tpu.vector_store %arg5[%c0_12, %c0_13], %13 {strides = array<i32>} : memref<16x32xbf16, #tpu.memory_space<vmem>>, vector<16x32xbf16>,
    } else {
    }
    return
  }
  func.func @transform_0(%arg0: i32, %arg1: i32, %arg2: i32) -> (i32, i32) {
    %c0_i32 = arith.constant 0 : i32
    return %arg0, %arg2 : i32, i32
  }
  func.func @transform_1(%arg0: i32, %arg1: i32, %arg2: i32) -> (i32, i32) {
    %c0_i32 = arith.constant 0 : i32
    return %arg2, %arg1 : i32, i32
  }
  func.func @transform_2(%arg0: i32, %arg1: i32, %arg2: i32) -> (i32, i32) {
    %c0_i32 = arith.constant 0 : i32
    return %arg0, %arg1 : i32, i32
  }
}

</mosaic_0001>

<bundles_post_ra>
// kernel: tpu_custom_call.1
= control target key start
LH: loop header
LB: loop body
LE: loop exit
PB: predicated region body
PF: predicated region fallthrough
CT: control target
= control target key end

     0   :  { %7 = vsyncpa [#allocation4], 0  ;;  %s329_s0 = inlined_call_operand.hbm [shape: bf16[16,32], index: 0, kind: input, shape index: {}]   ;;  %s330_s1 = inlined_call_operand.hbm [shape: bf16[32,32], index: 1, kind: input, shape index: {}]   ;;  %s331_s2 = inlined_call_operand.hbm [shape: bf16[16,32], index: 2, kind: output, shape index: {}]  }
   0x1   :  { %8 = vsyncpa [#allocation7], 0 }
   0x2   :  { %9 = vsyncpa [#allocation5], 0  ;;  %s257_s9 = smov [#allocation3]   ;;  %s185_s13 = scalar_lea.hbm %s329_s0, 128 }
   0x3   :  { %s15_s10 = sshll.u32 %s257_s9, 4  ;;  %p186_p0 = scmp.ne.s32.totalorder %s329_s0, %s185_s13  ;;  %s16_s10 = int_to_ptr.vmem [resolvable:$true] %s15_s10 }
   0x4   :  { %p189_p1 = scmp.lt.u32.totalorder %s185_s13, %s329_s0 }
   0x6   :  { %p191_p2 = pnand %p189_p1, %p186_p0 }
   0x8   :  { %194 = shalt.err (!%p191_p2)
}
   0x9   :  { %s195_s18 = scalar_lea.vmem %s16_s10, 128  ;;  %p200_p4 = scmp.lt.s32.totalorder %s16_s10, %s16_s10 }
   0xa   :  { %p196_p3 = scmp.ne.s32.totalorder %s16_s10, %s195_s18  ;;  %p201_p5 = scmp.lt.s32.totalorder %s195_s18, %s195_s18 }
   0xc   :  { %p202_p6 = por %p201_p5, %p200_p4 }
   0xe   :  { %p203_p7 = pnand %p202_p6, %p196_p3 }
  0x10   :  { %206 = shalt.err (!%p203_p7)
}
  0x11   :  { %s258_s19 = smov 64   ;;  %s259_s20 = smov 4  }
  0x12   :  { %21 = dma.hbm_to_vmem [thread:$0]  %s329_s0, 128, %s16_s10, [#allocation4], %s258_s19, %s258_s19, %s259_s20  }
  0x13   :  { %s260_s23 = smov [#allocation6]   ;;  %s207_s27 = scalar_lea.hbm %s330_s1, 256 }
  0x14   :  { %s27_s24 = sshll.u32 %s260_s23, 4  ;;  %p208_p8 = scmp.ne.s32.totalorder %s330_s1, %s207_s27  ;;  %s28_s24 = int_to_ptr.vmem [resolvable:$true] %s27_s24 }
  0x15   :  { %p211_p9 = scmp.lt.u32.totalorder %s207_s27, %s330_s1 }
  0x17   :  { %p213_p10 = pnand %p211_p9, %p208_p8 }
  0x19   :  { %216 = shalt.err (!%p213_p10)
}
  0x1a   :  { %s217_s4 = scalar_lea.vmem %s28_s24, 256  ;;  %p222_p12 = scmp.lt.s32.totalorder %s28_s24, %s28_s24 }
  0x1b   :  { %p218_p11 = scmp.ne.s32.totalorder %s28_s24, %s217_s4  ;;  %p223_p13 = scmp.lt.s32.totalorder %s217_s4, %s217_s4 }
  0x1d   :  { %p224_p0 = por %p223_p13, %p222_p12 }
  0x1f   :  { %p225_p1 = pnand %p224_p0, %p218_p11 }
  0x21   :  { %228 = shalt.err (!%p225_p1)
}
  0x22   :  { %33 = dma.hbm_to_vmem [thread:$0]  %s330_s1, 256, %s28_s24, [#allocation7], %s258_s19, %s258_s19, %s259_s20  }
  0x23   :  { %251 = dma.done.wait [#allocation4], 128  }
  0x24   :  { %252 = vsyncadd [#allocation4], 4294967168 }
  0x25   :  { %253 = dma.done.wait [#allocation7], 256  }
  0x26   :  { %254 = vsyncadd [#allocation7], 4294967040  ;;  %vm45_vm0 = vcmask 261120   ;;  %v261_v0 = vmov 0.0   ;;  %vm262_vm1 = vmmov 0   ;;  %v182_v1 = vld [vmem:[#allocation6] sm:$0xff]  }
  0x27   :  { %167 = vmatprep.subr.bf16.mxu0 %v261_v0  ;;  %171 = vmatprep.mubr.msk.bf16.mxu0 %vm262_vm1, %v261_v0  ;;  %46 = vst.msk [vmem:[#allocation2] sm:$0xff] %vm45_vm0, %v261_v0  ;;  %47 = vst.msk [vmem:[#allocation2 + $0x8] sm:$0xff] %vm45_vm0, %v261_v0  ;;  %v183_v2 = vld [vmem:[#allocation6 + $0x8] sm:$0xff]   ;;  %v184_v3 = vld [vmem:[#allocation3] sm:$0xff]   ;;  %vm135_vm2 = vcmask 257024   ;;  %s263_s1 = smov [#allocation8]  }
  0x28   :  { %168 = vmatpush3.bf16.msra.mxu0 %v182_v1  ;;  %s143_s6 = sshll.u32 %s263_s1, 4  ;;  %s144_s6 = int_to_ptr.vmem [resolvable:$true] %s143_s6 }
  0x29   :  { %169 = vmatprep.subr.bf16.mxu0 %v261_v0  ;;  %s229_s7 = scalar_lea.vmem %s144_s6, 128  ;;  %p234_p3 = scmp.lt.s32.totalorder %s144_s6, %s144_s6 }
  0x2a   :  { %p230_p2 = scmp.ne.s32.totalorder %s144_s6, %s229_s7  ;;  %p235_p4 = scmp.lt.s32.totalorder %s229_s7, %s229_s7 }
  0x2c   :  { %170 = vmatpush3.bf16.msra.mxu0 %v183_v2  ;;  %p236_p5 = por %p235_p4, %p234_p3 }
  0x2e   :  { %v48_v4 = vld [vmem:[#allocation2] sm:$0xff]  ;;  %v49_v6 = vld [vmem:[#allocation2 + $0x8] sm:$0xff]  ;;  %p237_p6 = pnand %p236_p5, %p230_p2 }
  0x2f   :  { %172 = vmatmul.mubr.msk.bf16.vlgmr.msra.gmra.mrb[0].mxu0 %vm45_vm0, %v184_v3 }
 0x102   :  { %v111_v5 = vpop.f32.mrb[0].mxu0 }
 0x103   :  { %v118_v7 = vadd.f32 %v111_v5, %v48_v4  ;;  %v173_v8 = vpop.f32.mrb[1].mxu0 }
 0x104   :  { %v114_v9 = vpop.f32.mrb[2].mxu0 }
 0x105   :  { %120 = vst.msk [vmem:[#allocation2] sm:$0xff] %vm45_vm0, %v118_v7  ;;  %v119_v10 = vadd.f32 %v114_v9, %v49_v6  ;;  %v174_v11 = vpop.f32.mrb[3].mxu0 }
 0x107   :  { %121 = vst.msk [vmem:[#allocation2 + $0x8] sm:$0xff] %vm45_vm0, %v119_v10 }
 0x10c   :  { %v125_v12 = vld [vmem:[#allocation2] sm:$0xff] }
 0x10d   :  { %v162_v13 = vpack.c.bf16 %v125_v12, %v125_v12 }
 0x10e   :  { %v126_v14 = vld [vmem:[#allocation2 + $0x8] sm:$0xff] }
 0x10f   :  { %v163_v15 = vpack.c.bf16 %v126_v14, %v126_v14  ;;  %136 = vst.msk [vmem:[#allocation8] sm:$0xf] %vm135_vm2, %v162_v13 }
 0x111   :  { %137 = vst.msk [vmem:[#allocation8 + $0x4] sm:$0xf] %vm135_vm2, %v163_v15 }
 0x112   :  { %240 = shalt.err (!%p237_p6)
}
 0x113   :  { %s241_s10 = scalar_lea.hbm %s331_s2, 128 }
 0x114   :  { %p242_p7 = scmp.ne.s32.totalorder %s331_s2, %s241_s10  ;;  %p245_p8 = scmp.lt.u32.totalorder %s241_s10, %s331_s2 }
 0x116   :  { %p247_p9 = pnand %p245_p8, %p242_p7 }
 0x118   :  { %250 = shalt.err (!%p247_p9)
}
 0x119   :  { %149 = dma.vmem_to_hbm [thread:$0]  %s144_s6, 128, %s331_s2, [#allocation5], %s258_s19, %s258_s19, %s259_s20  }
 0x11a   :  { %255 = dma.done.wait [#allocation5], 128  }
 0x11b   :  { %256 = vsyncadd [#allocation5], 4294967168 }
 0x11c   :  { %153 = vsyncpa [#allocation4], 1 }
 0x11d   :  { %154 = vsyncpa [#allocation7], 1 }
 0x11e   :  { %155 = vsyncpa [#allocation5], 1 }

</bundles_post_ra>
